<compile_context>
chip_gen: v7x
topology: tpu7x:2x2x1
jax: 0.10.0
libtpu: 0.0.40
codegen_flags: <defaults>
</compile_context>

<pallas_src>
import functools
import math

import jax
import jax.numpy as jnp
from jax.experimental import pallas as pl
from jax.experimental.pallas import tpu as pltpu

DEFAULT_LAYERNORM_EPS = 1e-12  # matches LinearLayer(layernorm_eps=1e-12) default


def _round_up(x: int, m: int) -> int:
    return (x + m - 1) // m * m


def _epilogue(y, p_ref, *, eps: float, approximate_gelu: bool):
    """bias + (eval-mode) dropout + LayerNorm + GELU on an f32 (tm, N) tile."""
    y = y + p_ref[0:1, :]                               # bias

    # Dropout: nn.Dropout is identity in eval/inference mode -> no-op.
    # TODO(synk): training-mode dropout (stochastic masking via pltpu.prng_*) not implemented.

    # LayerNorm over the full feature axis (resident in the block).
    # E[y^2] - E[y]^2 form: the two reductions are independent (better XLU overlap).
    mean = jnp.mean(y, axis=-1, keepdims=True)
    mean_sq = jnp.mean(y * y, axis=-1, keepdims=True)
    var = jnp.maximum(mean_sq - mean * mean, 0.0)
    yn = (y - mean) * jax.lax.rsqrt(var + eps)
    yn = yn * p_ref[1:2, :] + p_ref[2:3, :]             # gamma, beta

    if approximate_gelu:
        # tanh approximation -> EUP slot (otherwise idle in this epilogue).
        c = math.sqrt(2.0 / math.pi)
        return 0.5 * yn * (1.0 + jnp.tanh(c * (yn + 0.044715 * yn * yn * yn)))
    # Exact erf GELU (matches torch.nn.GELU() default).
    return 0.5 * yn * (1.0 + jax.lax.erf(yn * (1.0 / math.sqrt(2.0))))


def _fused_kernel(x_ref, w_ref, p_ref, o_ref, *, eps, approximate_gelu):
    # x_ref: (tm, K), w_ref: (K, N) pre-transposed, p_ref: (3, N) = [bias; gamma; beta].
    y = jnp.dot(x_ref[...], w_ref[...], preferred_element_type=jnp.float32)
    out = _epilogue(y, p_ref, eps=eps, approximate_gelu=approximate_gelu)
    o_ref[...] = out.astype(o_ref.dtype)


def _fused_kernel_ktiled(x_ref, w_ref, p_ref, o_ref, acc_ref, *, eps, approximate_gelu):
    # Grid = (row_tiles, K_tiles); K is the last ("arbitrary") axis with an f32 accumulator.
    k = pl.program_id(1)

    @pl.when(k == 0)
    def _():
        acc_ref[...] = jnp.zeros_like(acc_ref)

    acc_ref[...] += jnp.dot(x_ref[...], w_ref[...], preferred_element_type=jnp.float32)

    @pl.when(k == pl.num_programs(1) - 1)
    def _():
        out = _epilogue(acc_ref[...], p_ref, eps=eps, approximate_gelu=approximate_gelu)
        o_ref[...] = out.astype(o_ref.dtype)


def linear_layer_forward(x, weight_kn, bias, gamma, beta, *,
                         eps=DEFAULT_LAYERNORM_EPS,
                         tm=None,
                         k_tile=None,
                         approximate_gelu=False,
                         bf16_matmul=None,
                         single_buffer_invariants=True):
    """Fused Linear -> Dropout(eval) -> LayerNorm -> GELU.

    x:         (..., K) float32
    weight_kn: (K, N)   — torch's (N, K) weight pre-transposed ONCE (parameter-init time).
    bias/gamma/beta: (N,)
    """
    *lead, K = x.shape
    Kw, N = weight_kn.shape
    assert Kw == K, "weight_kn must be (input_size, output_size)"
    M = int(math.prod(lead)) if lead else 1
    out_dtype = x.dtype

    # --- row tile: megacore-aware (>= 2 grid steps once M >= 16), capped for VMEM ---------
    if tm is None:
        if M >= 16:
            tm = min(512, max(8, _round_up(pl.cdiv(M, 2), 8)))
        else:
            tm = max(8, _round_up(M, 8))
    tm = max(8, _round_up(tm, 8))
    num_row_tiles = pl.cdiv(M, tm)          # ragged last block handled by Pallas (no pad/slice)

    # --- optional K-reduction tiling (bounds VMEM working set for large K, esp. v7x) ------
    if k_tile is None:
        k_tile = 0
        if K >= 2048:
            for cand in (512, 256, 128):
                if K % cand == 0:
                    k_tile = cand
                    break
    if k_tile:
        assert k_tile % 128 == 0 and K % k_tile == 0, \
            "k_tile must be a multiple of 128 that divides K"

    # --- optional bf16 MXU path (f32 accumulation); irrelevant/off at toy sizes -----------
    if bf16_matmul is None:
        bf16_matmul = (K >= 512 and N >= 512)

    x2 = x.reshape(M, K)
    w = weight_kn
    if bf16_matmul:
        x2 = x2.astype(jnp.bfloat16)
        w = w.astype(jnp.bfloat16)

    # Fold bias / gamma / beta into a single (3, N) operand: one VMEM buffer, one DMA.
    params = jnp.stack([bias.astype(jnp.float32),
                        gamma.astype(jnp.float32),
                        beta.astype(jnp.float32)], axis=0)

    # --- VMEM budget (double-buffered activations, single-buffered invariants) ------------
    io_bytes = 2 if bf16_matmul else 4
    kb = k_tile if k_tile else K
    x_buf = 2 * tm * kb * io_bytes
    w_bufcount = 2 if k_tile else (1 if single_buffer_invariants else 2)
    w_buf = w_bufcount * kb * N * io_bytes
    o_buf = 2 * tm * N * jnp.dtype(out_dtype).itemsize
    p_buf = (1 if single_buffer_invariants else 2) * 3 * N * 4
    acc_buf = tm * N * 4 if k_tile else 0
    total_bytes = x_buf + w_buf + o_buf + p_buf + acc_buf
    vmem_limit = int(min(100 * (1 << 20),
                         max(int(total_bytes * 1.5) + (2 << 20), 16 * (1 << 20))))

    if single_buffer_invariants:
        p_spec_1d = pl.BlockSpec((3, N), lambda i: (0, 0), pipeline_mode=pl.Buffered(1))
        p_spec_2d = pl.BlockSpec((3, N), lambda i, k: (0, 0), pipeline_mode=pl.Buffered(1))
        w_spec_full = pl.BlockSpec((K, N), lambda i: (0, 0), pipeline_mode=pl.Buffered(1))
    else:
        p_spec_1d = pl.BlockSpec((3, N), lambda i: (0, 0))
        p_spec_2d = pl.BlockSpec((3, N), lambda i, k: (0, 0))
        w_spec_full = pl.BlockSpec((K, N), lambda i: (0, 0))

    if not k_tile:
        kernel = functools.partial(_fused_kernel, eps=eps,
                                   approximate_gelu=approximate_gelu)
        grid = (num_row_tiles,)
        in_specs = [
            pl.BlockSpec((tm, K), lambda i: (i, 0)),      # x row tile
            w_spec_full,                                  # full (K, N) weight, fetched once
            p_spec_1d,                                    # packed bias/gamma/beta
        ]
        out_specs = pl.BlockSpec((tm, N), lambda i: (i, 0))
        scratch_shapes = []
        dims = ("parallel",)
    else:
        kernel = functools.partial(_fused_kernel_ktiled, eps=eps,
                                   approximate_gelu=approximate_gelu)
        grid = (num_row_tiles, K // k_tile)
        in_specs = [
            pl.BlockSpec((tm, k_tile), lambda i, k: (i, k)),   # x row/K tile
            pl.BlockSpec((k_tile, N), lambda i, k: (k, 0)),    # weight K tile (changes -> 2-buf)
            p_spec_2d,                                         # packed bias/gamma/beta
        ]
        out_specs = pl.BlockSpec((tm, N), lambda i, k: (i, 0))
        scratch_shapes = [pltpu.VMEM((tm, N), jnp.float32)]
        dims = ("parallel", "arbitrary")

    out2 = pl.pallas_call(
        kernel,
        out_shape=jax.ShapeDtypeStruct((M, N), out_dtype),
        grid_spec=pltpu.PrefetchScalarGridSpec(
            num_scalar_prefetch=0,
            grid=grid,
            in_specs=in_specs,
            out_specs=out_specs,
            scratch_shapes=scratch_shapes,
        ),
        compiler_params=pltpu.CompilerParams(
            dimension_semantics=dims,
            vmem_limit_bytes=vmem_limit,
        ),
    )(x2, w, params)

    return out2.reshape(*lead, N)


def _reference(x, weight_nk, bias, gamma, beta, eps=DEFAULT_LAYERNORM_EPS):
    """Pure-JAX reference matching the PyTorch module (exact erf GELU, eval-mode dropout)."""
    y = x @ weight_nk.T + bias
    mean = y.mean(-1, keepdims=True)
    var = ((y - mean) ** 2).mean(-1, keepdims=True)
    yn = (y - mean) / jnp.sqrt(var + eps) * gamma + beta
    return 0.5 * yn * (1.0 + jax.lax.erf(yn / math.sqrt(2.0)))


if __name__ == "__main__":
    # Module config: LinearLayer(input_size=32, output_size=32, dropout=0.1, use_layernorm=True)
    input_size = 32
    output_size = 32
    batch, seq = 2, 8

    key = jax.random.PRNGKey(0)
    kx, kw, kb, kx2, kw2, kb2 = jax.random.split(key, 6)

    x = jax.random.normal(kx, (batch, seq, input_size), dtype=jnp.float32)

    # Deterministic parameter init mimicking nn.Linear default (uniform +-1/sqrt(fan_in)).
    bound = 1.0 / math.sqrt(input_size)
    weight = jax.random.uniform(kw, (output_size, input_size),        # torch (N, K) layout
                                minval=-bound, maxval=bound, dtype=jnp.float32)
    bias = jax.random.uniform(kb, (output_size,),
                              minval=-bound, maxval=bound, dtype=jnp.float32)
    gamma = jnp.ones((output_size,), dtype=jnp.float32)   # LayerNorm weight
    beta = jnp.zeros((output_size,), dtype=jnp.float32)   # LayerNorm bias

    # One-time transpose to (K, N) — in a real model this lives at parameter-init time.
    weight_kn = weight.T

    out = linear_layer_forward(x, weight_kn, bias, gamma, beta)
    jax.block_until_ready(out)
    ref = _reference(x, weight, bias, gamma, beta)
    assert out.shape == ref.shape
    assert jnp.allclose(out, ref, atol=1e-5, rtol=1e-5)

    # Also exercise the K-tiled reduction path (the v7x-VMEM-friendly configuration) at a
    # small-but-tileable size: K=256, k_tile=128.
    K2, N2 = 256, 32
    x_big = jax.random.normal(kx2, (batch, seq, K2), dtype=jnp.float32)
    bound2 = 1.0 / math.sqrt(K2)
    weight2 = jax.random.uniform(kw2, (N2, K2), minval=-bound2, maxval=bound2,
                                 dtype=jnp.float32)
    bias2 = jax.random.uniform(kb2, (N2,), minval=-bound2, maxval=bound2, dtype=jnp.float32)
    gamma2 = jnp.ones((N2,), dtype=jnp.float32)
    beta2 = jnp.zeros((N2,), dtype=jnp.float32)

    out2 = linear_layer_forward(x_big, weight2.T, bias2, gamma2, beta2, k_tile=128)
    jax.block_until_ready(out2)
    ref2 = _reference(x_big, weight2, bias2, gamma2, beta2)
    assert jnp.allclose(out2, ref2, atol=1e-5, rtol=1e-5)

    print("KERNEL_OK")
</pallas_src>

<mosaic_0001>
module attributes {stable_mosaic.version = 11 : i64} {
  func.func @_fused_kernel(%arg0: i32, %arg1: memref<8x32xf32, #tpu.memory_space<vmem>>, %arg2: memref<32x32xf32, #tpu.memory_space<vmem>>, %arg3: memref<3x32xf32, #tpu.memory_space<vmem>>, %arg4: memref<8x32xf32, #tpu.memory_space<vmem>>) attributes {dimension_semantics = [#tpu.dimension_semantics<parallel>], iteration_bounds = array<i64: 2>, scalar_prefetch = 0 : i64, scratch_operands = 0 : i64, tpu.core_type = #tpu.core_type<tc>, window_params = [{transform_indices = @transform_0, window_bounds = array<i64: 8, 32>}, {pipeline_mode = #tpu.pipeline_mode<synchronous>, transform_indices = @transform_1, window_bounds = array<i64: 32, 32>}, {pipeline_mode = #tpu.pipeline_mode<synchronous>, transform_indices = @transform_2, window_bounds = array<i64: 3, 32>}, {transform_indices = @transform_3, window_bounds = array<i64: 8, 32>}]} {
    %c0 = arith.constant 0 : index
    %c0_0 = arith.constant 0 : index
    %0 = vector.load %arg1[%c0, %c0_0] : memref<8x32xf32, #tpu.memory_space<vmem>>, vector<8x32xf32>
    %c0_1 = arith.constant 0 : index
    %c0_2 = arith.constant 0 : index
    %1 = vector.load %arg2[%c0_1, %c0_2] : memref<32x32xf32, #tpu.memory_space<vmem>>, vector<32x32xf32>
    %cst = arith.constant dense<0.000000e+00> : vector<8x32xf32>
    %2 = tpu.matmul %0, %1, %cst {dimension_numbers = #tpu.dot_dimension_numbers<[1], [0], [0], [1], [0, 0, 1, 1], [], []>} : vector<8x32xf32>, vector<32x32xf32>, vector<8x32xf32> -> vector<8x32xf32>
    %c0_3 = arith.constant 0 : index
    %c0_4 = arith.constant 0 : index
    %3 = vector.load %arg3[%c0_3, %c0_4] : memref<3x32xf32, #tpu.memory_space<vmem>>, vector<1x32xf32>
    %4 = vector.broadcast %3 : vector<1x32xf32> to vector<8x32xf32>
    %5 = arith.addf %2, %4 : vector<8x32xf32>
    %cst_5 = arith.constant dense<0.000000e+00> : vector<8xf32>
    %6 = vector.multi_reduction <add>, %5, %cst_5 [1] : vector<8x32xf32> to vector<8xf32>
    %7 = vector.shape_cast %6 : vector<8xf32> to vector<8x1xf32>
    %cst_6 = arith.constant 3.200000e+01 : f32
    %8 = vector.broadcast %cst_6 : f32 to vector<8x1xf32>
    %9 = arith.divf %7, %8 : vector<8x1xf32>
    %10 = arith.mulf %5, %5 : vector<8x32xf32>
    %cst_7 = arith.constant dense<0.000000e+00> : vector<8xf32>
    %11 = vector.multi_reduction <add>, %10, %cst_7 [1] : vector<8x32xf32> to vector<8xf32>
    %12 = vector.shape_cast %11 : vector<8xf32> to vector<8x1xf32>
    %cst_8 = arith.constant 3.200000e+01 : f32
    %13 = vector.broadcast %cst_8 : f32 to vector<8x1xf32>
    %14 = arith.divf %12, %13 : vector<8x1xf32>
    %15 = arith.mulf %9, %9 : vector<8x1xf32>
    %16 = arith.subf %14, %15 : vector<8x1xf32>
    %cst_9 = arith.constant 0.000000e+00 : f32
    %17 = vector.broadcast %cst_9 : f32 to vector<8x1xf32>
    %18 = arith.maximumf %16, %17 : vector<8x1xf32>
    %19 = vector.broadcast %9 : vector<8x1xf32> to vector<8x32xf32>
    %20 = arith.subf %5, %19 : vector<8x32xf32>
    %cst_10 = arith.constant 9.99999996E-13 : f32
    %21 = vector.broadcast %cst_10 : f32 to vector<8x1xf32>
    %22 = arith.addf %18, %21 : vector<8x1xf32>
    %23 = math.rsqrt %22 : vector<8x1xf32>
    %24 = vector.broadcast %23 : vector<8x1xf32> to vector<8x32xf32>
    %25 = arith.mulf %20, %24 : vector<8x32xf32>
    %c1 = arith.constant 1 : index
    %c0_11 = arith.constant 0 : index
    %26 = vector.load %arg3[%c1, %c0_11] : memref<3x32xf32, #tpu.memory_space<vmem>>, vector<1x32xf32>
    %27 = vector.broadcast %26 : vector<1x32xf32> to vector<8x32xf32>
    %28 = arith.mulf %25, %27 : vector<8x32xf32>
    %c2 = arith.constant 2 : index
    %c0_12 = arith.constant 0 : index
    %29 = vector.load %arg3[%c2, %c0_12] : memref<3x32xf32, #tpu.memory_space<vmem>>, vector<1x32xf32>
    %30 = vector.broadcast %29 : vector<1x32xf32> to vector<8x32xf32>
    %31 = arith.addf %28, %30 : vector<8x32xf32>
    %cst_13 = arith.constant 5.000000e-01 : f32
    %32 = vector.broadcast %cst_13 : f32 to vector<8x32xf32>
    %33 = arith.mulf %32, %31 : vector<8x32xf32>
    %cst_14 = arith.constant 0.707106769 : f32
    %34 = vector.broadcast %cst_14 : f32 to vector<8x32xf32>
    %35 = arith.mulf %31, %34 : vector<8x32xf32>
    %36 = math.erf %35 : vector<8x32xf32>
    %cst_15 = arith.constant 1.000000e+00 : f32
    %37 = vector.broadcast %cst_15 : f32 to vector<8x32xf32>
    %38 = arith.addf %37, %36 : vector<8x32xf32>
    %39 = arith.mulf %33, %38 : vector<8x32xf32>
    %c0_16 = arith.constant 0 : index
    %c0_17 = arith.constant 0 : index
    %40 = vector.load %arg4[%c0_16, %c0_17] : memref<8x32xf32, #tpu.memory_space<vmem>>, vector<8x32xf32>
    tpu.vector_store %arg4[%c0_16, %c0_17], %39 {strides = array<i32>} : memref<8x32xf32, #tpu.memory_space<vmem>>, vector<8x32xf32>,
    return
  }
  func.func @transform_0(%arg0: i32) -> (i32, i32) {
    %c0_i32 = arith.constant 0 : i32
    %c0_i32_0 = arith.constant 0 : i32
    return %arg0, %c0_i32 : i32, i32
  }
  func.func @transform_1(%arg0: i32) -> (i32, i32) {
    %c0_i32 = arith.constant 0 : i32
    %c0_i32_0 = arith.constant 0 : i32
    %c0_i32_1 = arith.constant 0 : i32
    return %c0_i32, %c0_i32_0 : i32, i32
  }
  func.func @transform_2(%arg0: i32) -> (i32, i32) {
    %c0_i32 = arith.constant 0 : i32
    %c0_i32_0 = arith.constant 0 : i32
    %c0_i32_1 = arith.constant 0 : i32
    return %c0_i32, %c0_i32_0 : i32, i32
  }
  func.func @transform_3(%arg0: i32) -> (i32, i32) {
    %c0_i32 = arith.constant 0 : i32
    %c0_i32_0 = arith.constant 0 : i32
    return %arg0, %c0_i32 : i32, i32
  }
}

</mosaic_0001>

<bundles_post_ra>
// kernel: tpu_custom_call.1
= control target key start
LH: loop header
LB: loop body
LE: loop exit
PB: predicated region body
PF: predicated region fallthrough
CT: control target
= control target key end

     0   :  { %8 = vsyncpa [#allocation3], 0  ;;  %s891_s0 = inlined_call_operand.hbm [shape: f32[16,32], index: 0, kind: input, shape index: {}]   ;;  %s892_s1 = inlined_call_operand.hbm [shape: f32[32,32], index: 1, kind: input, shape index: {}]   ;;  %s893_s2 = inlined_call_operand.vmem [shape: f32[3,32], index: 2, kind: input, shape index: {}]   ;;  %s894_s3 = inlined_call_operand.hbm [shape: f32[16,32], index: 3, kind: output, shape index: {}]  }
   0x1   :  { %10 = vsyncpa [#allocation3 + $0x1], 0 }
   0x2   :  { %11 = vsyncpa [#allocation6], 0 }
   0x3   :  { %12 = vsyncpa [#allocation4], 0 }
   0x4   :  { %14 = vsyncpa [#allocation4 + $0x1], 0  ;;  %s678_s12 = smov 0   ;;  %s680_s13 = smov 0  }
   0x5   :  { %s682_s14 = smov 0   ;;  %s684_s15 = smov 0  }
   0x6 LB: > { %s699_s16 = sadd.s32 4294967295, %s648_s15   ;;  %s414_s17 = sadd.s32 4294967294, %s648_s15   ;;  %s648_s15 = sphi %s684_s15, %s914_s15   ;;  %s644_s14 = sphi %s682_s14, %s913_s14   ;;  %s640_s13 = sphi %s680_s13, %s912_s13   ;;  %s636_s12 = sphi %s678_s12, %s911_s12  }
   0x7   : > { %p40_p0 = scmp.ne.s32.totalorder %s640_s13, %s636_s12  ;;  %p895_p1 = scmp.eq.s32.totalorder %s699_s16, 0 }
   0x8   : > { %p112_p3 = scmp.eq.s32.totalorder %s414_s17, 1  ;;  %p415_p5 = scmp.ge.s32.totalorder %s648_s15, 1 }
   0x9   : > { %p708_p4 = por %p895_p1, %p40_p0  ;;  %p119_p7 = scmp.lt.s32.totalorder %s648_s15, 3 }
   0xa   : > { %p713_p6 = por %p112_p3, %p40_p0  ;;  %s650_s21 = smov [#allocation5]  }
   0xb   : > { %s898_s18 = scalar_select %p708_p4, 1, 0 }
   0xc   : > { %s899_s19 = scalar_select %p713_p6, 1, 0 }
   0xd   : > { %p718_p8 = pnand %p415_p5, %p119_p7  ;;  %s131_s22 = sshll.u32 %s650_s21, 4  ;;  %s722_s22 = int_to_ptr.vmem [resolvable:$true] %s131_s22 }
   0xe   : > { %s734_s24 = sadd.s32 1, %s648_s15   ;;  %s27_s25 = sadd.s32 1, %s644_s14 }
   0xf   : > { %s900_s20 = scalar_select %p718_p8, 1, 0 }
  0x10   : > { %p462_p9 = pneg %p718_p8  ;;  %s24_s26 = ssub.s32 %s648_s15, %s734_s24 }
  0x11   : > { %s520_s29 = scalar_lea.hbm %s892_s1, 512 }
  0x12   : > { %p729_p11 = pnand %p462_p9, %p895_p1  ;;  %p521_p12 = scmp.ne.s32.totalorder %s892_s1, %s520_s29 }
  0x13   : > { %p527_p5 = scmp.lt.u32.totalorder %s520_s29, %s892_s1 }
  0x14   : > { %p522_p13 = pneg %p729_p11 }
  0x16   : > { %p523_p0 = pnand %p522_p13, %p521_p12 }
  0x18   : > { %p524_p3 = pneg %p523_p0 }
  0x1a   : > { %p529_p7 = pnand %p527_p5, %p524_p3 }
  0x1c   : > { %532 = shalt.err (!%p529_p7)
}
  0x1d   : > { %s533_s7 = scalar_lea.vmem %s722_s22, 512  ;;  %p541_p2 = scmp.lt.s32.totalorder %s722_s22, %s722_s22 }
  0x1e   : > { %p534_p9 = scmp.ne.s32.totalorder %s722_s22, %s533_s7  ;;  %p542_p6 = scmp.lt.s32.totalorder %s533_s7, %s533_s7 }
  0x20   : > { %p536_p10 = pnand %p534_p9, %p522_p13  ;;  %p543_p4 = por %p542_p6, %p541_p2 }
  0x22   : > { %p537_p1 = pneg %p536_p10 }
  0x24   : > { %p544_p8 = pnand %p543_p4, %p537_p1 }
  0x26   : > { %547 = shalt.err (!%p544_p8)
}
  0x27   : > { %s651_s8 = smov 128   ;;  %s652_s9 = smov 8  }
  0x28   : > { %465 = dma.hbm_to_vmem [thread:$0]  (!%p729_p11), %s892_s1, 512, %s722_s22, [#allocation6], %s651_s8, %s651_s8, %s652_s9  }
  0x29   : > { %p25_p2 = scmp.eq.s32.totalorder %s24_s26, 0  ;;  %p34_p1 = scmp.ne.s32.totalorder %s644_s14, %s640_s13 }
  0x2a   : > { %p35_p4 = scmp.eq.s32.totalorder %s648_s15, 0  ;;  %p475_p6 = scmp.lt.s32.totalorder %s648_s15, 2 }
  0x2b   : > { %s765_s17 = scalar_select %p25_p2, %s644_s14, %s27_s25  }
  0x2c   : > { %p36_p8 = por %p35_p4, %p34_p1  ;;  %p902_p10 = scmp.eq.s32.totalorder %s699_s16, 1 }
  0x2d   : > { %s148_s27 = sand.u32 1, %s644_s14   ;;  %s419_s28 = sshll.u32 %s648_s15, 7 }
  0x2e   : > { %p769_p12 = por %p902_p10, %p34_p1  ;;  %s418_s29 = sshll.u32 %s148_s27, 3 }
  0x2f   : > { %s778_s4 = scalar_lea.hbm %s891_s0, %s419_s28  ;;  %s152_s22 = scalar_lea.vmem [#allocation2], %s418_s29 }
  0x30   : > { %s159_s25 = sshll.u32 %s152_s22, 4  ;;  %p780_p11 = pnand %p475_p6, %p36_p8  ;;  %s784_s25 = int_to_ptr.vmem [resolvable:$true] %s159_s25 }
  0x31   : > { %s149_s5 = scalar_lea.sflag [#allocation3], %s148_s27  ;;  %s548_s6 = scalar_lea.hbm %s778_s4, 128 }
  0x32   : > { %p549_p13 = scmp.ne.s32.totalorder %s778_s4, %s548_s6  ;;  %p550_p0 = pneg %p780_p11 }
  0x33   : > { %s553_s9 = scalar_lea.hbm %s891_s0, 256  ;;  %p554_p7 = scmp.lt.u32.totalorder %s778_s4, %s891_s0 }
  0x34   : > { %p551_p3 = pnand %p550_p0, %p549_p13  ;;  %p555_p9 = scmp.lt.u32.totalorder %s553_s9, %s548_s6 }
  0x35   : > { %p557_p1 = scmp.lt.u32.totalorder %s548_s6, %s778_s4 }
  0x36   : > { %p552_p5 = pneg %p551_p3  ;;  %p556_p2 = por %p555_p9, %p554_p7 }
  0x38   : > { %p558_p4 = por %p557_p1, %p556_p2 }
  0x3a   : > { %p559_p6 = pnand %p558_p4, %p552_p5 }
  0x3c   : > { %562 = shalt.err (!%p559_p6)
}
  0x3d   : > { %s563_s27 = scalar_lea.vmem %s784_s25, 128  ;;  %s653_s28 = smov [#allocation2]  }
  0x3e   : > { %p564_p8 = scmp.ne.s32.totalorder %s784_s25, %s563_s27  ;;  %s568_s29 = sshll.u32 %s653_s28, 4  ;;  %s569_s29 = int_to_ptr.vmem [resolvable:$false] %s568_s29 }
  0x3f   : > { %s570_s23 = scalar_lea.vmem %s569_s29, 256  ;;  %p571_p3 = scmp.lt.s32.totalorder %s784_s25, %s569_s29 }
  0x40   : > { %p566_p10 = pnand %p564_p8, %p550_p0  ;;  %p572_p7 = scmp.lt.s32.totalorder %s570_s23, %s563_s27 }
  0x42   : > { %p567_p13 = pneg %p566_p10  ;;  %p573_p9 = por %p572_p7, %p571_p3 }
  0x44   : > { %p574_p2 = pnand %p573_p9, %p567_p13 }
  0x46   : > { %577 = shalt.err (!%p574_p2)
}
  0x47   : > { %469 = dma.hbm_to_vmem [thread:$0]  (!%p780_p11), %s778_s4, 128, %s784_s25, %s149_s5  }
  0x48   : > { %p905_p5 = scmp.ne.s32.totalorder %s900_s20, 0 }
  0x49   : > { %s814_s30 = sand.u32 (!%p905_p5), 1, %s640_s13   ;;  %p906_p0 = scmp.ne.s32.totalorder (!%p905_p5), %s898_s18, 0 }
  0x4a   : > { %168 = sbr.rel (%p905_p5) target bundleno = 512 (0x200), region = 32  ;;  %s421_s22 = sshll.u32 (!%p905_p5), %s814_s30, 3 }
  0x4b   : > { %s171_s6 = scalar_lea.sflag (!%p905_p5), [#allocation3], %s814_s30  ;;  %s174_s7 = scalar_lea.vmem (!%p905_p5), [#allocation2], %s421_s22 }
  0x51   : > { %623 = dma.done.wait (%p906_p0), %s171_s6, 128  }
  0x52   : > { %625 = vsyncadd (%p906_p0), %s171_s6, 4294967168  ;;  %p907_p11 = scmp.eq.s32.totalorder %s699_s16, 0 }
  0x54   : > { %627 = dma.done.wait (%p907_p11), [#allocation6], 512   ;;  %p908_p1 = pmov %p907_p11 }
  0x55   : > { %v654_v0 = vmov 0.0|0.0   ;;  %vm655_vm0 = vmmov 0   ;;  %v656_v1 = vmov 0.0   ;;  %v202_v2 = vld [vmem:[#allocation5] sm:$0xff]  ;;  %v203_v3 = vld [vmem:[#allocation5 + $0x8] sm:$0xff]  ;;  %v204_v4 = vld [vmem:[#allocation5 + $0x10] sm:$0xff] }
  0x56   : > { %629 = vsyncadd (%p908_p1), [#allocation6], 4294966784  ;;  %448 = vmatprep.subr.bf16.mxu0 %v654_v0  ;;  %445 = vmatprep.mubr.msk.f32.mxu0 %vm655_vm0, %v656_v1  ;;  %v449_v5 = vpack.c.bf16 %v203_v3, %v202_v2  ;;  %v205_v6 = vld [vmem:[#allocation5 + $0x18] sm:$0xff]  ;;  %vm211_vm1 = vcmask 261120   ;;  %v424_v9 = vld [vmem:[%s893_s2] ss:$0 sm:$0xff] }
  0x57   : > { %v452_v7 = vpack.c.bf16 %v205_v6, %v204_v4  ;;  %v201_v8 = vld [vmem:[%s174_s7] sm:$0xff]  ;;  %s429_s8 = sshll.u32 %s699_s16, 7  ;;  %s200_s9 = scalar_lea.vmem [#allocation7], %s421_s22 }
  0x58   : > { %450 = vmatpush3.bf16.msra.mxu0 %v449_v5  ;;  %v426_v26 = vld [vmem:[%s893_s2 + $0x1] ss:$0 sm:$0xff]  ;;  %v427_v28 = vld [vmem:[%s893_s2 + $0x2] ss:$0 sm:$0xff]  ;;  %s334_s10 = sshll.u32 %s200_s9, 4  ;;  %s846_s28 = scalar_lea.hbm %s894_s3, %s429_s8  ;;  %s848_s10 = int_to_ptr.vmem [resolvable:$true] %s334_s10 }
  0x59   : > { %451 = vmatprep.subr.bf16.mxu0 %v654_v0  ;;  %s321_s29 = scalar_lea.sflag [#allocation4], %s814_s30  ;;  %s578_s16 = scalar_lea.vmem %s848_s10, 128 }
  0x5a   : > { %p579_p4 = scmp.ne.s32.totalorder %s848_s10, %s578_s16  ;;  %s657_s23 = smov [#allocation7]  }
  0x5b   : > { %s582_s22 = sshll.u32 %s657_s23, 4  ;;  %s583_s22 = int_to_ptr.vmem [resolvable:$false] %s582_s22 }
  0x5c   : > { %453 = vmatpush3.bf16.msra.mxu0 %v452_v7  ;;  %p580_p6 = pnand %p579_p4, %p769_p12  ;;  %s584_s6 = scalar_lea.vmem %s583_s22, 256 }
  0x5d   : > { %p585_p10 = scmp.lt.s32.totalorder %s848_s10, %s583_s22  ;;  %p586_p13 = scmp.lt.s32.totalorder %s584_s6, %s578_s16 }
  0x5e   : > { %p581_p8 = pneg %p580_p6 }
  0x5f   : > { %446 = vmatmul.mubr.msk.f32.vlgmr.msra.gmra.mrb[0].mxu0 %vm211_vm1, %v201_v8  ;;  %p587_p3 = por %p586_p13, %p585_p10 }
  0x61   : > { %p588_p7 = pnand %p587_p3, %p581_p8 }
 0x132   : > { %v281_v10 = vpop.f32.mrb[0].mxu0 }
 0x133   : > { %v282_v11 = vadd.f32 %v424_v9, %v281_v10  ;;  %v447_v12 = vpop.f32.mrb[1].mxu0 }
 0x135   : > { %v285_v13 = vsel %vm211_vm1, %v282_v11, 0.0  ;;  %v290_v14 = vmul.f32 %v282_v11, %v282_v11 }
 0x136   : > { %286 = vadd.xlane.f32.xlu0 %v285_v13 }
 0x137   : > { %v291_v15 = vsel %vm211_vm1, %v290_v14, 0.0 }
 0x13a   : > { %292 = vadd.xlane.f32.xlu0 %v291_v15 }
 0x1c3   : > { %v287_v16 = vpop.xlane.xlu0 %286 }
 0x1c4   : > { %v289_v17 = vmul.f32 0.03125, %v287_v16 }
 0x1c6   : > { %v295_v19 = vmul.f32 %v289_v17, %v289_v17  ;;  %v298_v24 = vsub.f32 %v282_v11, %v289_v17 }
 0x1c7   : > { %v293_v18 = vpop.xlane.xlu0 %292 }
 0x1c8   : > { %v294_v20 = vmul.f32 0.03125, %v293_v18 }
 0x1ca   : > { %v296_v21 = vsub.f32 %v294_v20, %v295_v19 }
 0x1cc   : > { %v297_v22 = vmax.f32 %v296_v21, 0.0 }
 0x1ce   : > { %v299_v23 = vadd.f32 1e-12, %v297_v22 }
 0x1d0   : > { %516 = vrsqrt.f32 %v299_v23 }
 0x1da   : > { %v517_v25 = vpop.eup %516 }
 0x1db   : > { %v301_v27 = vmul.f32 %v517_v25, %v298_v24 }
 0x1dd   : > { %v307_v29 = vmul.f32 %v426_v26, %v301_v27 }
 0x1df   : > { %v313_v30 = vadd.f32 %v427_v28, %v307_v29 }
 0x1e1   : > { %v315_v31 = vmul.f32 0.70710677, %v313_v30  ;;  %v314_v33 = vmul.f32 0.5, %v313_v30 }
 0x1e3   : > { %518 = verf.f32 %v315_v31 }
 0x1ed   : > { %v519_v32 = vpop.eup %518 }
 0x1ee   : > { %v317_v34 = vadd.f32 1.0, %v519_v32 }
 0x1f0   : > { %v318_v35 = vmul.f32 %v317_v34, %v314_v33 }
 0x1f2   : > { %319 = vst.msk [vmem:[%s200_s9] sm:$0xff] %vm211_vm1, %v318_v35 }
 0x1f3   : > { %591 = shalt.err (!%p588_p7)
}
 0x1f4   : > { %s592_s30 = scalar_lea.hbm %s846_s28, 128  ;;  %s596_s20 = scalar_lea.hbm %s894_s3, 256 }
 0x1f5   : > { %p593_p9 = scmp.ne.s32.totalorder %s846_s28, %s592_s30  ;;  %p597_p0 = scmp.lt.u32.totalorder %s846_s28, %s894_s3 }
 0x1f6   : > { %p598_p11 = scmp.lt.u32.totalorder %s596_s20, %s592_s30  ;;  %p600_p4 = scmp.lt.u32.totalorder %s592_s30, %s846_s28 }
 0x1f7   : > { %p594_p2 = pnand %p593_p9, %p769_p12 }
 0x1f8   : > { %p599_p1 = por %p598_p11, %p597_p0 }
 0x1f9   : > { %p595_p5 = pneg %p594_p2 }
 0x1fa   : > { %p601_p6 = por %p600_p4, %p599_p1 }
 0x1fc   : > { %p602_p8 = pnand %p601_p6, %p595_p5 }
 0x1fe   : > { %605 = shalt.err (!%p602_p8)
}
 0x1ff   : > { %460 = dma.vmem_to_hbm [thread:$0]  (%p769_p12), %s848_s10, 128, %s846_s28, %s321_s29  }
 0x200 PF: > { %s346_s26 = sand.u32 1, %s636_s12   ;;  %p909_p10 = scmp.ne.s32.totalorder %s899_s19, 0 }
 0x201   : > { %p910_p13 = scmp.ge.s32.totalorder %s648_s15, 2  ;;  %s347_s5 = scalar_lea.sflag [#allocation4], %s346_s26 }
 0x203   : > { %p471_p3 = pnand %p910_p13, %p909_p10 }
 0x205   : > { %631 = dma.done.wait (!%p471_p3), %s347_s5, 128  }
 0x206   : > { %633 = vsyncadd (!%p471_p3), %s347_s5, 4294967168  ;;  %p17_p7 = scmp.ge.s32.totalorder %s734_s24, 4   ;;  %s911_s12 = smov %s640_s13 }
 0x207   : > { %s912_s13 = smov %s644_s14  ;;  %s913_s14 = smov %s765_s17 }
 0x208   : > { %s914_s15 = smov %s734_s24  ;;  %19 = sbr.rel (!%p17_p7) target bundleno = 6 (0x6), region = 81 }
 0x20f   :  { %352 = vsyncpa [#allocation3], 1 }
 0x210   :  { %354 = vsyncpa [#allocation3 + $0x1], 1 }
 0x211   :  { %355 = vsyncpa [#allocation6], 1 }
 0x212   :  { %356 = vsyncpa [#allocation4], 1 }
 0x213   :  { %358 = vsyncpa [#allocation4 + $0x1], 1 }

</bundles_post_ra>
